<compile_context>
chip_gen: v7x
topology: tpu7x:2x2x1
jax: 0.10.0
libtpu: 0.0.40
codegen_flags: <defaults>
</compile_context>

<pallas_src>
import functools

import jax
import jax.numpy as jnp
from jax.experimental import pallas as pl
from jax.experimental.pallas import tpu as pltpu

A_PAD = 128          # lane-dense padded action dimension (compute only, never stored)
NEG_INF = -1.0e30    # bias value for padded (fake) actions -> exp() == 0
MAX_TILE_B = 4096    # large batch tile: mem-bound workload, amortize per-step overhead
VMEM_LIMIT_BYTES = 48 * 1024 * 1024  # headroom for big tiles on v5e (16 MiB default)


def _round_up(x, m):
    return ((x + m - 1) // m) * m


def _policy_kernel(x_ref, w1t_ref, b1_ref, w2t_ref, b2_ref, out_ref):
    # x:   (TILE_B, D)
    # w1t: (D, H)       b1: (1, H)
    # w2t: (H, A_PAD)   b2: (1, A_PAD)   (padded actions have bias = -1e30)
    # out: (TILE_B, A)  -- compact, only the real actions are stored
    x = x_ref[...]

    # Linear 1 + ReLU (hidden activation)
    h = jnp.dot(x, w1t_ref[...], preferred_element_type=jnp.float32) + b1_ref[...]
    h = jnp.maximum(h, 0.0)

    # Linear 2 (output activation = identity); padded lanes get logit ~ -1e30,
    # keeping the matmul / exp / reduction lane-dense.
    logits = jnp.dot(h, w2t_ref[...], preferred_element_type=jnp.float32) + b2_ref[...]

    # softmax over the (padded) action axis; padded lanes contribute exp(-huge)=0.
    m = jnp.max(logits, axis=-1, keepdims=True)
    e = jnp.exp(logits - m)
    denom = jnp.sum(e, axis=-1, keepdims=True)

    # Store only the real action probabilities (exact divide -- hidden under DMA).
    num_actions = out_ref.shape[-1]
    out_ref[...] = e[:, :num_actions] / denom


def prepare_params(params):
    """One-time parameter prep: transpose to (in, out) layout, pad actions to 128 lanes."""
    w1, b1, w2, b2 = params["w1"], params["b1"], params["w2"], params["b2"]
    H, D = w1.shape
    A = w2.shape[0]
    w1t = jnp.asarray(w1.T, jnp.float32)                              # (D, H)
    w2t = jnp.zeros((H, A_PAD), jnp.float32).at[:, :A].set(w2.T)      # (H, 128)
    b1_2d = jnp.asarray(b1, jnp.float32).reshape(1, H)                # (1, H)
    b2_2d = jnp.full((1, A_PAD), NEG_INF, jnp.float32).at[0, :A].set(b2)
    return {"w1t": w1t, "b1": b1_2d, "w2t": w2t, "b2": b2_2d, "num_actions": A}


@functools.partial(jax.jit, static_argnames=("num_actions",))
def _forward_impl(states, w1t, b1, w2t, b2, *, num_actions):
    B, D = states.shape
    H = w1t.shape[1]
    A = num_actions

    # Aim for >= 2 grid steps when the batch allows it (feeds both TCs on v7x),
    # capped at MAX_TILE_B, always a multiple of 8 sublanes.
    tile_b = max(8, min(MAX_TILE_B, _round_up(pl.cdiv(B, 2), 8)))
    grid = (pl.cdiv(B, tile_b),)

    out = pl.pallas_call(
        _policy_kernel,
        out_shape=jax.ShapeDtypeStruct((B, A), jnp.float32),
        grid=grid,
        in_specs=[
            # states: tiled over the batch axis.
            pl.BlockSpec((tile_b, D), lambda i: (i, 0)),
            # weights / biases: constant block index -> stay resident in VMEM.
            pl.BlockSpec((D, H), lambda i: (0, 0)),
            pl.BlockSpec((1, H), lambda i: (0, 0)),
            pl.BlockSpec((H, A_PAD), lambda i: (0, 0)),
            pl.BlockSpec((1, A_PAD), lambda i: (0, 0)),
        ],
        # Compact output: block last dim == full array dim (A), so no padded HBM bytes.
        out_specs=pl.BlockSpec((tile_b, A), lambda i: (i, 0)),
        compiler_params=pltpu.CompilerParams(
            dimension_semantics=("parallel",),      # megacore shard on v7x
            vmem_limit_bytes=VMEM_LIMIT_BYTES,      # big tiles OK on v5e too
        ),
    )(states, w1t, b1, w2t, b2)
    return out


def discrete_gaussian_policy_forward(states, prepped):
    """states: (B, D) float32. prepped: output of prepare_params()."""
    return _forward_impl(
        states,
        prepped["w1t"], prepped["b1"], prepped["w2t"], prepped["b2"],
        num_actions=prepped["num_actions"],
    )


def init_params(key, input_dim=32, hidden=64, actions=8):
    # Deterministic init mimicking nn.Linear's U(-1/sqrt(fan_in), 1/sqrt(fan_in)).
    k1, k2, k3, k4 = jax.random.split(key, 4)
    bound1 = 1.0 / jnp.sqrt(input_dim)
    bound2 = 1.0 / jnp.sqrt(hidden)
    return {
        "w1": jax.random.uniform(k1, (hidden, input_dim), jnp.float32, -bound1, bound1),
        "b1": jax.random.uniform(k2, (hidden,), jnp.float32, -bound1, bound1),
        "w2": jax.random.uniform(k3, (actions, hidden), jnp.float32, -bound2, bound2),
        "b2": jax.random.uniform(k4, (actions,), jnp.float32, -bound2, bound2),
    }


def _reference_forward(states, params):
    h = jnp.maximum(states @ params["w1"].T + params["b1"], 0.0)
    logits = h @ params["w2"].T + params["b2"]
    return jax.nn.softmax(logits, axis=1)


if __name__ == "__main__":
    key = jax.random.PRNGKey(0)
    kx, kx2, kp = jax.random.split(key, 3)

    B, D, H, A = 2, 32, 64, 8
    states = jax.random.normal(kx, (B, D), dtype=jnp.float32)
    params = init_params(kp, input_dim=D, hidden=H, actions=A)
    prepped = prepare_params(params)

    # Small-batch run (single partial tile).
    probs = discrete_gaussian_policy_forward(states, prepped)
    probs = jax.block_until_ready(probs)
    ref = _reference_forward(states, params)
    assert probs.shape == (B, A)
    assert jnp.allclose(probs, ref, atol=1e-4, rtol=1e-4)
    assert jnp.allclose(jnp.sum(probs, axis=1), 1.0, atol=1e-5)

    # Larger batch exercising a multi-step grid (2 tiles, partial last tile).
    B2 = 1030
    states2 = jax.random.normal(kx2, (B2, D), dtype=jnp.float32)
    probs2 = jax.block_until_ready(discrete_gaussian_policy_forward(states2, prepped))
    ref2 = _reference_forward(states2, params)
    assert probs2.shape == (B2, A)
    assert jnp.allclose(probs2, ref2, atol=1e-4, rtol=1e-4)
    assert jnp.allclose(jnp.sum(probs2, axis=1), 1.0, atol=1e-5)

    print("KERNEL_OK")
</pallas_src>

<mosaic_0001>
module attributes {stable_mosaic.version = 11 : i64} {
  func.func @_policy_kernel(%arg0: i32, %arg1: memref<8x32xf32, #tpu.memory_space<vmem>>, %arg2: memref<32x64xf32, #tpu.memory_space<vmem>>, %arg3: memref<1x64xf32, #tpu.memory_space<vmem>>, %arg4: memref<64x128xf32, #tpu.memory_space<vmem>>, %arg5: memref<1x128xf32, #tpu.memory_space<vmem>>, %arg6: memref<8x8xf32, #tpu.memory_space<vmem>>) attributes {dimension_semantics = [#tpu.dimension_semantics<parallel>], iteration_bounds = array<i64: 1>, scalar_prefetch = 0 : i64, scratch_operands = 0 : i64, tpu.core_type = #tpu.core_type<tc>, window_params = [{transform_indices = @transform_0, window_bounds = array<i64: 8, 32>}, {pipeline_mode = #tpu.pipeline_mode<synchronous>, transform_indices = @transform_1, window_bounds = array<i64: 32, 64>}, {pipeline_mode = #tpu.pipeline_mode<synchronous>, transform_indices = @transform_2, window_bounds = array<i64: 1, 64>}, {pipeline_mode = #tpu.pipeline_mode<synchronous>, transform_indices = @transform_3, window_bounds = array<i64: 64, 128>}, {pipeline_mode = #tpu.pipeline_mode<synchronous>, transform_indices = @transform_4, window_bounds = array<i64: 1, 128>}, {transform_indices = @transform_5, window_bounds = array<i64: 8, 8>}]} {
    %c0 = arith.constant 0 : index
    %c0_0 = arith.constant 0 : index
    %0 = vector.load %arg1[%c0, %c0_0] : memref<8x32xf32, #tpu.memory_space<vmem>>, vector<8x32xf32>
    %c0_1 = arith.constant 0 : index
    %c0_2 = arith.constant 0 : index
    %1 = vector.load %arg2[%c0_1, %c0_2] : memref<32x64xf32, #tpu.memory_space<vmem>>, vector<32x64xf32>
    %cst = arith.constant dense<0.000000e+00> : vector<8x64xf32>
    %2 = tpu.matmul %0, %1, %cst {dimension_numbers = #tpu.dot_dimension_numbers<[1], [0], [0], [1], [0, 0, 1, 1], [], []>} : vector<8x32xf32>, vector<32x64xf32>, vector<8x64xf32> -> vector<8x64xf32>
    %c0_3 = arith.constant 0 : index
    %c0_4 = arith.constant 0 : index
    %3 = vector.load %arg3[%c0_3, %c0_4] : memref<1x64xf32, #tpu.memory_space<vmem>>, vector<1x64xf32>
    %4 = vector.broadcast %3 : vector<1x64xf32> to vector<8x64xf32>
    %5 = arith.addf %2, %4 : vector<8x64xf32>
    %cst_5 = arith.constant 0.000000e+00 : f32
    %6 = vector.broadcast %cst_5 : f32 to vector<8x64xf32>
    %7 = arith.maximumf %5, %6 : vector<8x64xf32>
    %c0_6 = arith.constant 0 : index
    %c0_7 = arith.constant 0 : index
    %8 = vector.load %arg4[%c0_6, %c0_7] : memref<64x128xf32, #tpu.memory_space<vmem>>, vector<64x128xf32>
    %cst_8 = arith.constant dense<0.000000e+00> : vector<8x128xf32>
    %9 = tpu.matmul %7, %8, %cst_8 {dimension_numbers = #tpu.dot_dimension_numbers<[1], [0], [0], [1], [0, 0, 1, 1], [], []>} : vector<8x64xf32>, vector<64x128xf32>, vector<8x128xf32> -> vector<8x128xf32>
    %c0_9 = arith.constant 0 : index
    %c0_10 = arith.constant 0 : index
    %10 = vector.load %arg5[%c0_9, %c0_10] : memref<1x128xf32, #tpu.memory_space<vmem>>, vector<1x128xf32>
    %11 = vector.broadcast %10 : vector<1x128xf32> to vector<8x128xf32>
    %12 = arith.addf %9, %11 : vector<8x128xf32>
    %cst_11 = arith.constant dense<0xFF800000> : vector<8xf32>
    %13 = vector.multi_reduction <maximumf>, %12, %cst_11 [1] : vector<8x128xf32> to vector<8xf32>
    %14 = vector.shape_cast %13 : vector<8xf32> to vector<8x1xf32>
    %15 = vector.broadcast %14 : vector<8x1xf32> to vector<8x128xf32>
    %16 = arith.subf %12, %15 : vector<8x128xf32>
    %17 = math.exp %16 : vector<8x128xf32>
    %cst_12 = arith.constant dense<0.000000e+00> : vector<8xf32>
    %18 = vector.multi_reduction <add>, %17, %cst_12 [1] : vector<8x128xf32> to vector<8xf32>
    %19 = vector.shape_cast %18 : vector<8xf32> to vector<8x1xf32>
    %20 = vector.extract_strided_slice %17 {offsets = [0, 0], sizes = [8, 8], strides = [1, 1]} : vector<8x128xf32> to vector<8x8xf32>
    %21 = vector.broadcast %19 : vector<8x1xf32> to vector<8x8xf32>
    %22 = arith.divf %20, %21 : vector<8x8xf32>
    %c0_13 = arith.constant 0 : index
    %c0_14 = arith.constant 0 : index
    %23 = vector.load %arg6[%c0_13, %c0_14] : memref<8x8xf32, #tpu.memory_space<vmem>>, vector<8x8xf32>
    tpu.vector_store %arg6[%c0_13, %c0_14], %22 {strides = array<i32>} : memref<8x8xf32, #tpu.memory_space<vmem>>, vector<8x8xf32>,
    return
  }
  func.func @transform_0(%arg0: i32) -> (i32, i32) {
    %c0_i32 = arith.constant 0 : i32
    %c0_i32_0 = arith.constant 0 : i32
    return %arg0, %c0_i32 : i32, i32
  }
  func.func @transform_1(%arg0: i32) -> (i32, i32) {
    %c0_i32 = arith.constant 0 : i32
    %c0_i32_0 = arith.constant 0 : i32
    %c0_i32_1 = arith.constant 0 : i32
    return %c0_i32, %c0_i32_0 : i32, i32
  }
  func.func @transform_2(%arg0: i32) -> (i32, i32) {
    %c0_i32 = arith.constant 0 : i32
    %c0_i32_0 = arith.constant 0 : i32
    %c0_i32_1 = arith.constant 0 : i32
    return %c0_i32, %c0_i32_0 : i32, i32
  }
  func.func @transform_3(%arg0: i32) -> (i32, i32) {
    %c0_i32 = arith.constant 0 : i32
    %c0_i32_0 = arith.constant 0 : i32
    %c0_i32_1 = arith.constant 0 : i32
    return %c0_i32, %c0_i32_0 : i32, i32
  }
  func.func @transform_4(%arg0: i32) -> (i32, i32) {
    %c0_i32 = arith.constant 0 : i32
    %c0_i32_0 = arith.constant 0 : i32
    %c0_i32_1 = arith.constant 0 : i32
    return %c0_i32, %c0_i32_0 : i32, i32
  }
  func.func @transform_5(%arg0: i32) -> (i32, i32) {
    %c0_i32 = arith.constant 0 : i32
    %c0_i32_0 = arith.constant 0 : i32
    return %arg0, %c0_i32 : i32, i32
  }
}

</mosaic_0001>

<bundles_post_ra>
// kernel: _forward_impl.1
= control target key start
LH: loop header
LB: loop body
LE: loop exit
PB: predicated region body
PF: predicated region fallthrough
CT: control target
= control target key end

     0   :  { %10 = vsyncpa [#allocation3], 0  ;;  %s549_s0 = inlined_call_operand.hbm [shape: f32[2,32], index: 0, kind: input, shape index: {}]   ;;  %s550_s1 = inlined_call_operand.hbm [shape: f32[32,64], index: 1, kind: input, shape index: {}]   ;;  %s551_s2 = inlined_call_operand.vmem [shape: f32[1,64], index: 2, kind: input, shape index: {}]   ;;  %s552_s3 = inlined_call_operand.hbm [shape: f32[64,128], index: 3, kind: input, shape index: {}]   ;;  %s553_s4 = inlined_call_operand.vmem [shape: f32[1,128], index: 4, kind: input, shape index: {}]   ;;  %s554_s5 = inlined_call_operand.hbm [shape: f32[2,8], index: 5, kind: output, shape index: {}]  }
   0x1   :  { %11 = vsyncpa [#allocation6], 0 }
   0x2   :  { %12 = vsyncpa [#allocation4], 0 }
   0x3   :  { %17 = vsyncadd [#allocation3], 96  ;;  %s442_s18 = smov [#allocation5]   ;;  %s348_s22 = scalar_lea.hbm %s550_s1, 512 }
   0x4   :  { %s30_s19 = sshll.u32 %s442_s18, 4  ;;  %p349_p0 = scmp.ne.s32.totalorder %s550_s1, %s348_s22  ;;  %s31_s19 = int_to_ptr.vmem [resolvable:$true] %s30_s19 }
   0x5   :  { %p352_p1 = scmp.lt.u32.totalorder %s348_s22, %s550_s1 }
   0x7   :  { %p354_p2 = pnand %p352_p1, %p349_p0 }
   0x9   :  { %357 = shalt.err (!%p354_p2)
}
   0xa   :  { %s358_s27 = scalar_lea.vmem %s31_s19, 512  ;;  %p363_p4 = scmp.lt.s32.totalorder %s31_s19, %s31_s19 }
   0xb   :  { %p359_p3 = scmp.ne.s32.totalorder %s31_s19, %s358_s27  ;;  %p364_p5 = scmp.lt.s32.totalorder %s358_s27, %s358_s27 }
   0xd   :  { %p365_p6 = por %p364_p5, %p363_p4 }
   0xf   :  { %p366_p7 = pnand %p365_p6, %p359_p3 }
  0x11   :  { %369 = shalt.err (!%p366_p7)
}
  0x12   :  { %s443_s28 = smov 128   ;;  %s444_s29 = smov 8  }
  0x13   :  { %36 = dma.hbm_to_vmem [thread:$0]  %s550_s1, 512, %s31_s19, [#allocation6], %s443_s28, %s443_s28, %s444_s29  }
  0x14   :  { %s445_s7 = smov [#allocation2]   ;;  %s370_s11 = scalar_lea.hbm %s549_s0, 32 }
  0x15   :  { %s18_s8 = sshll.u32 %s445_s7, 4  ;;  %p371_p8 = scmp.ne.s32.totalorder %s549_s0, %s370_s11  ;;  %s19_s8 = int_to_ptr.vmem [resolvable:$true] %s18_s8 }
  0x16   :  { %p374_p9 = scmp.lt.u32.totalorder %s370_s11, %s549_s0 }
  0x18   :  { %p376_p10 = pnand %p374_p9, %p371_p8 }
  0x1a   :  { %379 = shalt.err (!%p376_p10)
}
  0x1b   :  { %s380_s16 = scalar_lea.vmem %s19_s8, 32  ;;  %s384_s1 = scalar_lea.vmem %s19_s8, 128 }
  0x1c   :  { %p381_p11 = scmp.ne.s32.totalorder %s19_s8, %s380_s16  ;;  %p385_p12 = scmp.lt.s32.totalorder %s19_s8, %s19_s8 }
  0x1d   :  { %p386_p13 = scmp.lt.s32.totalorder %s384_s1, %s380_s16 }
  0x1f   :  { %p387_p0 = por %p386_p13, %p385_p12 }
  0x21   :  { %p388_p1 = pnand %p387_p0, %p381_p11 }
  0x23   :  { %391 = shalt.err (!%p388_p1)
}
  0x24   :  { %s446_s17 = smov 32   ;;  %s447_s18 = smov 2  }
  0x25   :  { %24 = dma.hbm_to_vmem [thread:$0]  %s549_s0, 32, %s19_s8, [#allocation3], %s446_s17, %s446_s17, %s447_s18  }
  0x26   :  { %s448_s21 = smov [#allocation7]   ;;  %s392_s25 = scalar_lea.hbm %s552_s3, 1024 }
  0x27   :  { %s44_s22 = sshll.u32 %s448_s21, 4  ;;  %p393_p2 = scmp.ne.s32.totalorder %s552_s3, %s392_s25  ;;  %s45_s22 = int_to_ptr.vmem [resolvable:$true] %s44_s22 }
  0x28   :  { %p396_p3 = scmp.lt.u32.totalorder %s392_s25, %s552_s3 }
  0x2a   :  { %p398_p4 = pnand %p396_p3, %p393_p2 }
  0x2c   :  { %401 = shalt.err (!%p398_p4)
}
  0x2d   :  { %s402_s7 = scalar_lea.vmem %s45_s22, 1024  ;;  %p407_p6 = scmp.lt.s32.totalorder %s45_s22, %s45_s22 }
  0x2e   :  { %p403_p5 = scmp.ne.s32.totalorder %s45_s22, %s402_s7  ;;  %p408_p7 = scmp.lt.s32.totalorder %s402_s7, %s402_s7 }
  0x30   :  { %p409_p8 = por %p408_p7, %p407_p6 }
  0x32   :  { %p410_p9 = pnand %p409_p8, %p403_p5 }
  0x34   :  { %413 = shalt.err (!%p410_p9)
}
  0x35   :  { %50 = dma.hbm_to_vmem [thread:$0]  %s552_s3, 1024, %s45_s22, [#allocation6], %s443_s28, %s443_s28, %s444_s29  }
  0x36   :  { %436 = dma.done.wait [#allocation3], 128  }
  0x37   :  { %437 = vsyncadd [#allocation3], 4294967168 }
  0x38   :  { %438 = dma.done.wait [#allocation6], 1536  }
  0x39   :  { %439 = vsyncadd [#allocation6], 4294965760  ;;  %v449_v0 = vmov 0.0|0.0   ;;  %vm450_vm0 = vmmov 0   ;;  %v451_v1 = vmov 0.0   ;;  %v63_v2 = vld [vmem:[#allocation5] sm:$0xff] }
  0x3a   :  { %315 = vmatprep.subr.bf16.mxu0 %v449_v0  ;;  %293 = vmatprep.mubr.msk.f32.mxu0 %vm450_vm0, %v451_v1  ;;  %v64_v3 = vld [vmem:[#allocation5 + $0x8] sm:$0xff]  ;;  %v65_v4 = vld [vmem:[#allocation5 + $0x10] sm:$0xff]  ;;  %v66_v6 = vld [vmem:[#allocation5 + $0x18] sm:$0xff]  ;;  %vm74_vm1 = vcmask 261120   ;;  %vm164_vm2 = vcmask 523264   ;;  %vm247_vm3 = vcmask 64512  }
  0x3b   :  { %321 = vmatprep.subr.bf16.mxu1 %v449_v0  ;;  %312 = vmatprep.mubr.msk.f32.mxu1 %vm450_vm0, %v451_v1  ;;  %v316_v5 = vpack.c.bf16 %v64_v3, %v63_v2  ;;  %v149_v7 = vld [vmem:[#allocation7] sm:$0xff]  ;;  %v150_v8 = vld [vmem:[#allocation7 + $0x8] sm:$0xff]  ;;  %v151_v9 = vld [vmem:[#allocation7 + $0x10] sm:$0xff]  ;;  %v319_v11 = vpack.c.bf16 %v66_v6, %v65_v4 }
  0x3c   :  { %v152_v10 = vld [vmem:[#allocation7 + $0x18] sm:$0xff]  ;;  %v322_v12 = vpack.c.bf16 %v150_v8, %v149_v7  ;;  %v153_v14 = vld [vmem:[#allocation7 + $0x20] sm:$0xff]  ;;  %v154_v15 = vld [vmem:[#allocation7 + $0x28] sm:$0xff] }
  0x3d   :  { %317 = vmatpush3.bf16.msra.mxu0 %v316_v5  ;;  %v325_v13 = vpack.c.bf16 %v152_v10, %v151_v9  ;;  %v62_v16 = vld [vmem:[#allocation2] sm:$0xff]  ;;  %v328_v17 = vpack.c.bf16 %v154_v15, %v153_v14  ;;  %v155_v18 = vld [vmem:[#allocation7 + $0x30] sm:$0xff] }
  0x3e   :  { %318 = vmatprep.subr.bf16.mxu0 %v449_v0  ;;  %323 = vmatpush3.bf16.msra.mxu1 %v322_v12  ;;  %v156_v19 = vld [vmem:[#allocation7 + $0x38] sm:$0xff] }
  0x3f   :  { %324 = vmatprep.subr.bf16.mxu1 %v449_v0  ;;  %v331_v20 = vpack.c.bf16 %v156_v19, %v155_v18  ;;  %v267_v21 = vld [vmem:[%s551_s2] ss:$0 sm:$0xff] }
  0x40   :  { %v269_v26 = vld [vmem:[%s553_s4] ss:$0 sm:$0xff] }
  0x41   :  { %320 = vmatpush3.bf16.msra.mxu0 %v319_v11 }
  0x42   :  { %326 = vmatpush3.bf16.msra.mxu1 %v325_v13 }
  0x43   :  { %327 = vmatprep.subr.bf16.mxu1 %v449_v0 }
  0x44   :  { %294 = vmatmul.mubr.msk.f32.vlgmr.msra.gmra.mrb[0].mxu0 %vm74_vm1, %v62_v16 }
  0x46   :  { %329 = vmatpush3.bf16.msra.mxu1 %v328_v17 }
  0x47   :  { %330 = vmatprep.subr.bf16.mxu1 %v449_v0 }
  0x4a   :  { %332 = vmatpush3.bf16.msra.mxu1 %v331_v20 }
 0x117   :  { %v144_v22 = vpop.f32.mrb[0].mxu0 }
 0x118   :  { %v145_v23 = vadd.f32 %v267_v21, %v144_v22  ;;  %v295_v24 = vpop.f32.mrb[1].mxu0 }
 0x11a   :  { %v148_v25 = vmax.f32 %v145_v23, 0.0 }
 0x11c   :  { %313 = vmatmul.mubr.msk.f32.vlgmr.msra.gmra.mrb[0].mxu1 %vm164_vm2, %v148_v25 }
 0x1ef   :  { %v234_v27 = vpop.f32.mrb[0].mxu1 }
 0x1f0   :  { %v235_v28 = vadd.f32 %v269_v26, %v234_v27  ;;  %v314_v29 = vpop.f32.mrb[1].mxu1 }
 0x1f2   :  { %238 = vmax.xlane.f32.xlu0 %v235_v28 }
 0x27f   :  { %v239_v30 = vpop.xlane.xlu0 %238 }
 0x280   :  { %v240_v31 = vsub.f32 %v235_v28, %v239_v30 }
 0x282   :  { %v241_v32 = vmul.f32 1.442695, %v240_v31 }
 0x284   :  { %344 = vpow2.f32 %v241_v32 }
 0x28e   :  { %v345_v33 = vpop.eup %344 }
 0x28f   :  { %243 = vadd.xlane.f32.xlu0 %v345_v33 }
 0x31c   :  { %v244_v34 = vpop.xlane.xlu0 %243 }
 0x31d   :  { %346 = vrcp.f32 %v244_v34 }
 0x327   :  { %v347_v35 = vpop.eup %346 }
 0x328   :  { %v246_v36 = vmul.f32 %v347_v35, %v345_v33 }
 0x32a   :  { %248 = vst.msk [vmem:[#allocation8] sm:$0xff] %vm247_vm3, %v246_v36 }
 0x32b   :  { %253 = vsyncadd [#allocation4], 96  ;;  %s452_s2 = smov [#allocation8]  }
 0x32c   :  { %s254_s10 = sshll.u32 %s452_s2, 4  ;;  %s255_s10 = int_to_ptr.vmem [resolvable:$true] %s254_s10 }
 0x32d   :  { %s414_s4 = scalar_lea.vmem %s255_s10, 32  ;;  %s418_s11 = scalar_lea.vmem %s255_s10, 128 }
 0x32e   :  { %p415_p10 = scmp.ne.s32.totalorder %s255_s10, %s414_s4  ;;  %p419_p11 = scmp.lt.s32.totalorder %s255_s10, %s255_s10 }
 0x32f   :  { %p420_p12 = scmp.lt.s32.totalorder %s418_s11, %s414_s4 }
 0x331   :  { %p421_p13 = por %p420_p12, %p419_p11 }
 0x333   :  { %p422_p0 = pnand %p421_p13, %p415_p10 }
 0x335   :  { %425 = shalt.err (!%p422_p0)
}
 0x336   :  { %s426_s14 = scalar_lea.hbm %s554_s5, 32 }
 0x337   :  { %p427_p1 = scmp.ne.s32.totalorder %s554_s5, %s426_s14  ;;  %p430_p2 = scmp.lt.u32.totalorder %s426_s14, %s554_s5 }
 0x339   :  { %p432_p3 = pnand %p430_p2, %p427_p1 }
 0x33b   :  { %435 = shalt.err (!%p432_p3)
}
 0x33c   :  { %260 = dma.vmem_to_hbm [thread:$0]  %s255_s10, 32, %s554_s5, [#allocation4], %s446_s17, %s446_s17, %s447_s18  }
 0x33d   :  { %440 = dma.done.wait [#allocation4], 128  }
 0x33e   :  { %441 = vsyncadd [#allocation4], 4294967168 }
 0x33f   :  { %264 = vsyncpa [#allocation3], 1 }
 0x340   :  { %265 = vsyncpa [#allocation6], 1 }
 0x341   :  { %266 = vsyncpa [#allocation4], 1 }

</bundles_post_ra>
